<compile_context>
chip_gen: v7x
topology: tpu7x:2x2x1
jax: 0.10.0
libtpu: 0.0.40
codegen_flags: <defaults>
</compile_context>

<pallas_src>
import jax
import jax.numpy as jnp
from jax.experimental import pallas as pl
from jax.experimental.pallas import tpu as pltpu

B = 2
C_IN = 4
H = W = 16
DIM_MLP = 32       # small stand-in for dim_mlp=2048
PROJ_DIM = 16      # projection_dim
KK = 9             # 3x3 taps
TAP_DIM = KK * C_IN          # 36  (lane-dense im2col width)
BHW = B * H * W              # 512 rows per view
OUT_PAD = 128                # lane-dense padded output width
N_VIEWS = 2


def encoder_kernel(x_ref, wconv_ref, bconv_ref, pool_ref,
                   w1_ref, b1_ref, w2_ref, b2_ref, out_ref):
    # ---- 3x3 conv fused into a single MXU matmul: (BHW, 36) @ (36, DIM_MLP) ----
    acc = jnp.dot(x_ref[...], wconv_ref[...], preferred_element_type=jnp.float32)
    acc = jnp.maximum(acc + bconv_ref[...], 0.0)                 # bias + ReLU

    # ---- global average pool on the MXU: (B, BHW) @ (BHW, DIM_MLP) ----
    feat = jnp.dot(pool_ref[...], acc, preferred_element_type=jnp.float32)

    # ---- projection head: Linear -> ReLU -> Linear (padded to 128 lanes) ----
    h = jnp.dot(feat, w1_ref[...], preferred_element_type=jnp.float32) + b1_ref[...]
    h = jnp.maximum(h, 0.0)
    out_ref[0] = (jnp.dot(h, w2_ref[...], preferred_element_type=jnp.float32)
                  + b2_ref[...])                                  # (B, OUT_PAD) lane-dense store


def _im2col_taps(x_nchw):
    # NCHW -> NHWC, zero-pad, and build a lane-dense (B*H*W, 9*C_IN) im2col matrix.
    # Tap order (kh, kw, c) matches w_conv reshaped from (3,3,C_IN,DIM_MLP) to (36, DIM_MLP).
    # TODO(synk): at real scale (dim_mlp=2048, full-res images) build taps in-kernel
    # from a single padded NHWC tile instead of materializing a 9x tensor in HBM.
    n = x_nchw.shape[0]
    x = jnp.transpose(x_nchw, (0, 2, 3, 1))
    xp = jnp.pad(x, ((0, 0), (1, 1), (1, 1), (0, 0)))
    taps = [xp[:, kh:kh + H, kw:kw + W, :] for kh in range(3) for kw in range(3)]
    return jnp.concatenate(taps, axis=-1).reshape(n * H * W, TAP_DIM)


def image_encoder_forward(x1, x2, params):
    # ImageEncoder.forward: h1 = encoder(x1); h2 = encoder(x2); return (h1, h2)
    # Both views run in ONE pallas_call (grid axis over views, parallel on v7x).
    w_conv, b_conv, pool, w1, b1, w2p, b2p = params
    x_taps = jnp.concatenate([_im2col_taps(x1), _im2col_taps(x2)], axis=0)  # (2*BHW, 36)

    out = pl.pallas_call(
        encoder_kernel,
        out_shape=jax.ShapeDtypeStruct((N_VIEWS, B, OUT_PAD), jnp.float32),
        grid=(N_VIEWS,),
        in_specs=[
            pl.BlockSpec((BHW, TAP_DIM), lambda v: (v, 0)),        # per-view im2col tile
            pl.BlockSpec((TAP_DIM, DIM_MLP), lambda v: (0, 0)),    # fused conv weight
            pl.BlockSpec((1, DIM_MLP), lambda v: (0, 0)),          # conv bias
            pl.BlockSpec((B, BHW), lambda v: (0, 0)),              # avg-pool matrix
            pl.BlockSpec((DIM_MLP, DIM_MLP), lambda v: (0, 0)),    # proj Linear 1
            pl.BlockSpec((1, DIM_MLP), lambda v: (0, 0)),
            pl.BlockSpec((DIM_MLP, OUT_PAD), lambda v: (0, 0)),    # proj Linear 2 (lane-padded)
            pl.BlockSpec((1, OUT_PAD), lambda v: (0, 0)),
        ],
        out_specs=pl.BlockSpec((1, B, OUT_PAD), lambda v: (v, 0, 0)),
        compiler_params=pltpu.CompilerParams(
            dimension_semantics=("parallel",)),
    )(x_taps, w_conv, b_conv, pool, w1, b1, w2p, b2p)

    h = out[:, :, :PROJ_DIM]        # strip lane padding in the wrapper
    return h[0], h[1]


def init_params(key):
    # Weights stored directly in their final kernel layouts.
    ks = jax.random.split(key, 6)
    w_conv = (jax.random.normal(ks[0], (3, 3, C_IN, DIM_MLP), jnp.float32) * 0.1
              ).reshape(TAP_DIM, DIM_MLP)                          # (36, DIM_MLP)
    b_conv = jax.random.normal(ks[1], (1, DIM_MLP), jnp.float32) * 0.01
    w1 = jax.random.normal(ks[2], (DIM_MLP, DIM_MLP), jnp.float32) * 0.1
    b1 = jax.random.normal(ks[3], (1, DIM_MLP), jnp.float32) * 0.01
    w2 = jax.random.normal(ks[4], (DIM_MLP, PROJ_DIM), jnp.float32) * 0.1
    b2 = jax.random.normal(ks[5], (1, PROJ_DIM), jnp.float32) * 0.01
    # pad final Linear to 128 output lanes so the kernel's store is unmasked
    w2p = jnp.pad(w2, ((0, 0), (0, OUT_PAD - PROJ_DIM)))
    b2p = jnp.pad(b2, ((0, 0), (0, OUT_PAD - PROJ_DIM)))
    # constant block-averaging matrix: feat[b] = mean over that sample's H*W rows
    rows = jnp.arange(B)[:, None]
    cols = jnp.arange(BHW)[None, :] // (H * W)
    pool = jnp.where(rows == cols, 1.0 / (H * W), 0.0).astype(jnp.float32)
    return (w_conv, b_conv, pool, w1, b1, w2p, b2p)


def reference_encode(x_nchw, params):
    # pure-JAX reference of the same synthetic encoder, for correctness check
    w_conv, b_conv, _, w1, b1, w2p, b2p = params
    w2 = w2p[:, :PROJ_DIM]
    b2 = b2p[:, :PROJ_DIM]
    x = jnp.transpose(x_nchw, (0, 2, 3, 1))
    w = w_conv.reshape(3, 3, C_IN, DIM_MLP)
    y = jax.lax.conv_general_dilated(
        x, w, window_strides=(1, 1), padding="SAME",
        dimension_numbers=("NHWC", "HWIO", "NHWC"))
    y = jnp.maximum(y + b_conv.reshape(1, 1, 1, DIM_MLP), 0.0)
    feat = jnp.mean(y, axis=(1, 2))
    h = jnp.maximum(feat @ w1 + b1, 0.0)
    return h @ w2 + b2


if __name__ == "__main__":
    key = jax.random.PRNGKey(0)
    kx1, kx2, kp = jax.random.split(key, 3)
    x1 = jax.random.normal(kx1, (B, C_IN, H, W), jnp.float32)   # NCHW like PyTorch
    x2 = jax.random.normal(kx2, (B, C_IN, H, W), jnp.float32)
    params = init_params(kp)

    h1, h2 = image_encoder_forward(x1, x2, params)
    h1 = jax.block_until_ready(h1)
    h2 = jax.block_until_ready(h2)

    r1 = reference_encode(x1, params)
    r2 = reference_encode(x2, params)
    assert h1.shape == (B, PROJ_DIM) and h2.shape == (B, PROJ_DIM)
    assert jnp.allclose(h1, r1, atol=1e-4, rtol=1e-4)
    assert jnp.allclose(h2, r2, atol=1e-4, rtol=1e-4)

    print("KERNEL_OK")
</pallas_src>

<mosaic_0001>
module attributes {stable_mosaic.version = 11 : i64} {
  func.func @encoder_kernel(%arg0: i32, %arg1: memref<512x36xf32, #tpu.memory_space<vmem>>, %arg2: memref<36x32xf32, #tpu.memory_space<vmem>>, %arg3: memref<1x32xf32, #tpu.memory_space<vmem>>, %arg4: memref<2x512xf32, #tpu.memory_space<vmem>>, %arg5: memref<32x32xf32, #tpu.memory_space<vmem>>, %arg6: memref<1x32xf32, #tpu.memory_space<vmem>>, %arg7: memref<32x128xf32, #tpu.memory_space<vmem>>, %arg8: memref<1x128xf32, #tpu.memory_space<vmem>>, %arg9: memref<1x2x128xf32, #tpu.memory_space<vmem>>) attributes {dimension_semantics = [#tpu.dimension_semantics<parallel>], iteration_bounds = array<i64: 2>, scalar_prefetch = 0 : i64, scratch_operands = 0 : i64, tpu.core_type = #tpu.core_type<tc>, window_params = [{transform_indices = @transform_0, window_bounds = array<i64: 512, 36>}, {pipeline_mode = #tpu.pipeline_mode<synchronous>, transform_indices = @transform_1, window_bounds = array<i64: 36, 32>}, {pipeline_mode = #tpu.pipeline_mode<synchronous>, transform_indices = @transform_2, window_bounds = array<i64: 1, 32>}, {pipeline_mode = #tpu.pipeline_mode<synchronous>, transform_indices = @transform_3, window_bounds = array<i64: 2, 512>}, {pipeline_mode = #tpu.pipeline_mode<synchronous>, transform_indices = @transform_4, window_bounds = array<i64: 32, 32>}, {pipeline_mode = #tpu.pipeline_mode<synchronous>, transform_indices = @transform_5, window_bounds = array<i64: 1, 32>}, {pipeline_mode = #tpu.pipeline_mode<synchronous>, transform_indices = @transform_6, window_bounds = array<i64: 32, 128>}, {pipeline_mode = #tpu.pipeline_mode<synchronous>, transform_indices = @transform_7, window_bounds = array<i64: 1, 128>}, {transform_indices = @transform_8, window_bounds = array<i64: 1, 2, 128>}]} {
    %c0 = arith.constant 0 : index
    %c0_0 = arith.constant 0 : index
    %0 = vector.load %arg1[%c0, %c0_0] : memref<512x36xf32, #tpu.memory_space<vmem>>, vector<512x36xf32>
    %c0_1 = arith.constant 0 : index
    %c0_2 = arith.constant 0 : index
    %1 = vector.load %arg2[%c0_1, %c0_2] : memref<36x32xf32, #tpu.memory_space<vmem>>, vector<36x32xf32>
    %cst = arith.constant dense<0.000000e+00> : vector<512x32xf32>
    %2 = tpu.matmul %0, %1, %cst {dimension_numbers = #tpu.dot_dimension_numbers<[1], [0], [0], [1], [0, 0, 1, 1], [], []>} : vector<512x36xf32>, vector<36x32xf32>, vector<512x32xf32> -> vector<512x32xf32>
    %c0_3 = arith.constant 0 : index
    %c0_4 = arith.constant 0 : index
    %3 = vector.load %arg3[%c0_3, %c0_4] : memref<1x32xf32, #tpu.memory_space<vmem>>, vector<1x32xf32>
    %4 = vector.broadcast %3 : vector<1x32xf32> to vector<512x32xf32>
    %5 = arith.addf %2, %4 : vector<512x32xf32>
    %cst_5 = arith.constant 0.000000e+00 : f32
    %6 = vector.broadcast %cst_5 : f32 to vector<512x32xf32>
    %7 = arith.maximumf %5, %6 : vector<512x32xf32>
    %c0_6 = arith.constant 0 : index
    %c0_7 = arith.constant 0 : index
    %8 = vector.load %arg4[%c0_6, %c0_7] : memref<2x512xf32, #tpu.memory_space<vmem>>, vector<2x512xf32>
    %cst_8 = arith.constant dense<0.000000e+00> : vector<2x32xf32>
    %9 = tpu.matmul %8, %7, %cst_8 {dimension_numbers = #tpu.dot_dimension_numbers<[1], [0], [0], [1], [0, 0, 1, 1], [], []>} : vector<2x512xf32>, vector<512x32xf32>, vector<2x32xf32> -> vector<2x32xf32>
    %c0_9 = arith.constant 0 : index
    %c0_10 = arith.constant 0 : index
    %10 = vector.load %arg5[%c0_9, %c0_10] : memref<32x32xf32, #tpu.memory_space<vmem>>, vector<32x32xf32>
    %cst_11 = arith.constant dense<0.000000e+00> : vector<2x32xf32>
    %11 = tpu.matmul %9, %10, %cst_11 {dimension_numbers = #tpu.dot_dimension_numbers<[1], [0], [0], [1], [0, 0, 1, 1], [], []>} : vector<2x32xf32>, vector<32x32xf32>, vector<2x32xf32> -> vector<2x32xf32>
    %c0_12 = arith.constant 0 : index
    %c0_13 = arith.constant 0 : index
    %12 = vector.load %arg6[%c0_12, %c0_13] : memref<1x32xf32, #tpu.memory_space<vmem>>, vector<1x32xf32>
    %13 = vector.broadcast %12 : vector<1x32xf32> to vector<2x32xf32>
    %14 = arith.addf %11, %13 : vector<2x32xf32>
    %cst_14 = arith.constant 0.000000e+00 : f32
    %15 = vector.broadcast %cst_14 : f32 to vector<2x32xf32>
    %16 = arith.maximumf %14, %15 : vector<2x32xf32>
    %c0_15 = arith.constant 0 : index
    %c0_16 = arith.constant 0 : index
    %17 = vector.load %arg7[%c0_15, %c0_16] : memref<32x128xf32, #tpu.memory_space<vmem>>, vector<32x128xf32>
    %cst_17 = arith.constant dense<0.000000e+00> : vector<2x128xf32>
    %18 = tpu.matmul %16, %17, %cst_17 {dimension_numbers = #tpu.dot_dimension_numbers<[1], [0], [0], [1], [0, 0, 1, 1], [], []>} : vector<2x32xf32>, vector<32x128xf32>, vector<2x128xf32> -> vector<2x128xf32>
    %c0_18 = arith.constant 0 : index
    %c0_19 = arith.constant 0 : index
    %19 = vector.load %arg8[%c0_18, %c0_19] : memref<1x128xf32, #tpu.memory_space<vmem>>, vector<1x128xf32>
    %20 = vector.broadcast %19 : vector<1x128xf32> to vector<2x128xf32>
    %21 = arith.addf %18, %20 : vector<2x128xf32>
    %c0_20 = arith.constant 0 : index
    %c0_21 = arith.constant 0 : index
    %c0_22 = arith.constant 0 : index
    %22 = vector.load %arg9[%c0_20, %c0_21, %c0_22] : memref<1x2x128xf32, #tpu.memory_space<vmem>>, vector<1x2x128xf32>
    %23 = vector.shape_cast %22 : vector<1x2x128xf32> to vector<2x128xf32>
    %24 = vector.shape_cast %21 : vector<2x128xf32> to vector<1x2x128xf32>
    tpu.vector_store %arg9[%c0_20, %c0_21, %c0_22], %24 {strides = array<i32>} : memref<1x2x128xf32, #tpu.memory_space<vmem>>, vector<1x2x128xf32>,
    return
  }
  func.func @transform_0(%arg0: i32) -> (i32, i32) {
    %c0_i32 = arith.constant 0 : i32
    %c0_i32_0 = arith.constant 0 : i32
    return %arg0, %c0_i32 : i32, i32
  }
  func.func @transform_1(%arg0: i32) -> (i32, i32) {
    %c0_i32 = arith.constant 0 : i32
    %c0_i32_0 = arith.constant 0 : i32
    %c0_i32_1 = arith.constant 0 : i32
    return %c0_i32, %c0_i32_0 : i32, i32
  }
  func.func @transform_2(%arg0: i32) -> (i32, i32) {
    %c0_i32 = arith.constant 0 : i32
    %c0_i32_0 = arith.constant 0 : i32
    %c0_i32_1 = arith.constant 0 : i32
    return %c0_i32, %c0_i32_0 : i32, i32
  }
  func.func @transform_3(%arg0: i32) -> (i32, i32) {
    %c0_i32 = arith.constant 0 : i32
    %c0_i32_0 = arith.constant 0 : i32
    %c0_i32_1 = arith.constant 0 : i32
    return %c0_i32, %c0_i32_0 : i32, i32
  }
  func.func @transform_4(%arg0: i32) -> (i32, i32) {
    %c0_i32 = arith.constant 0 : i32
    %c0_i32_0 = arith.constant 0 : i32
    %c0_i32_1 = arith.constant 0 : i32
    return %c0_i32, %c0_i32_0 : i32, i32
  }
  func.func @transform_5(%arg0: i32) -> (i32, i32) {
    %c0_i32 = arith.constant 0 : i32
    %c0_i32_0 = arith.constant 0 : i32
    %c0_i32_1 = arith.constant 0 : i32
    return %c0_i32, %c0_i32_0 : i32, i32
  }
  func.func @transform_6(%arg0: i32) -> (i32, i32) {
    %c0_i32 = arith.constant 0 : i32
    %c0_i32_0 = arith.constant 0 : i32
    %c0_i32_1 = arith.constant 0 : i32
    return %c0_i32, %c0_i32_0 : i32, i32
  }
  func.func @transform_7(%arg0: i32) -> (i32, i32) {
    %c0_i32 = arith.constant 0 : i32
    %c0_i32_0 = arith.constant 0 : i32
    %c0_i32_1 = arith.constant 0 : i32
    return %c0_i32, %c0_i32_0 : i32, i32
  }
  func.func @transform_8(%arg0: i32) -> (i32, i32, i32) {
    %c0_i32 = arith.constant 0 : i32
    %c0_i32_0 = arith.constant 0 : i32
    %c0_i32_1 = arith.constant 0 : i32
    return %arg0, %c0_i32, %c0_i32_0 : i32, i32, i32
  }
}

</mosaic_0001>

<bundles_post_ra>
// kernel: tpu_custom_call.1
= control target key start
LH: loop header
LB: loop body
LE: loop exit
PB: predicated region body
PF: predicated region fallthrough
CT: control target
= control target key end

     0   :  { %13 = vsyncpa [#allocation3], 0  ;;  %s2452_s0 = inlined_call_operand.vmem [shape: f32[1024,36], index: 0, kind: input, shape index: {}]   ;;  %s2453_s1 = inlined_call_operand.vmem [shape: f32[36,32], index: 1, kind: input, shape index: {}]   ;;  %s2454_s2 = inlined_call_operand.vmem [shape: f32[1,32], index: 2, kind: input, shape index: {}]   ;;  %s2455_s3 = inlined_call_operand.vmem [shape: f32[2,512], index: 3, kind: input, shape index: {}]   ;;  %s2456_s4 = inlined_call_operand.vmem [shape: f32[32,32], index: 4, kind: input, shape index: {}]   ;;  %s2457_s5 = inlined_call_operand.vmem [shape: f32[1,32], index: 5, kind: input, shape index: {}]   ;;  %s2458_s6 = inlined_call_operand.vmem [shape: f32[32,128], index: 6, kind: input, shape index: {}]   ;;  %s2459_s7 = inlined_call_operand.vmem [shape: f32[1,128], index: 7, kind: input, shape index: {}]   ;;  %s2460_s8 = inlined_call_operand.hbm [shape: f32[2,2,128], index: 8, kind: output, shape index: {}]  }
   0x1   :  { %15 = vsyncpa [#allocation3 + $0x1], 0  ;;  %s2041_s27 = smov 0   ;;  %s2043_s28 = smov 0  }
   0x2   :  { %s2045_s29 = smov 0   ;;  %s2047_s30 = smov 0  }
   0x3 LB: > { %s2062_s9 = sadd.s32 4294967295, %s1989_s30   ;;  %s1435_s10 = sadd.s32 4294967294, %s1989_s30   ;;  %s1989_s30 = sphi %s2047_s30, %s2466_s30   ;;  %s1985_s29 = sphi %s2045_s29, %s2465_s29   ;;  %s1981_s28 = sphi %s2043_s28, %s2464_s28   ;;  %s1977_s27 = sphi %s2041_s27, %s2463_s27  }
   0x4   : > { %s2066_s11 = sadd.s32 1, %s1989_s30   ;;  %s201_s12 = sadd.s32 1, %s1985_s29 }
   0x5   : > { %s198_s13 = ssub.s32 %s1989_s30, %s2066_s11  ;;  %p211_p0 = scmp.ne.s32.totalorder %s1985_s29, %s1981_s28 }
   0x6   : > { %p199_p1 = scmp.eq.s32.totalorder %s198_s13, 0  ;;  %p212_p2 = scmp.eq.s32.totalorder %s2062_s9, 1 }
   0x7   : > { %p217_p3 = scmp.ne.s32.totalorder %s1981_s28, %s1977_s27  ;;  %p218_p4 = scmp.eq.s32.totalorder %s1435_s10, 1 }
   0x8   : > { %s2077_s14 = scalar_select %p199_p1, %s1985_s29, %s201_s12  }
   0x9   : > { %p2079_p5 = por %p212_p2, %p211_p0  ;;  %p2083_p6 = por %p218_p4, %p217_p3 }
   0xa   : > { %p1438_p7 = scmp.ge.s32.totalorder %s1989_s30, 1  ;;  %p266_p8 = scmp.lt.s32.totalorder %s1989_s30, 3 }
   0xc   : > { %p267_p9 = pnand %p1438_p7, %p266_p8 }
   0xd   : > { %v370_v0 = vld [vmem:[%s2453_s1] sm:$0xff] (!%p267_p9)  ;;  %v371_v1 = vld [vmem:[%s2453_s1 + $0x8] sm:$0xff] (!%p267_p9)  ;;  %v372_v2 = vld [vmem:[%s2453_s1 + $0x10] sm:$0xff] (!%p267_p9)  ;;  %s1440_s23 = sshll.u32 (!%p267_p9), %s2062_s9, 6  ;;  %vm382_vm0 = vcmask (!%p267_p9), 293888   ;;  %vm575_vm1 = vcmask (!%p267_p9), 1043456  }
   0xe   : > { %270 = sbr.rel (%p267_p9) target bundleno = 1002 (0x3ea), region = 52  ;;  %v1793_v3 = vpack.c.bf16 (!%p267_p9), %v371_v1, %v370_v0  ;;  %v373_v4 = vld [vmem:[%s2453_s1 + $0x18] sm:$0xff] (!%p267_p9)  ;;  %p301_p10 = scmp.lt.s32.totalorder (!%p267_p9), %s1440_s23, 127  ;;  %v374_v6 = vld [vmem:[%s2453_s1 + $0x20] sm:$0xf] (!%p267_p9)  ;;  %vm1993_vm2 = vmmov (!%p267_p9), 0  }
   0xf   : > { %v1797_v5 = vpack.c.bf16 (!%p267_p9), %v373_v4, %v372_v2  ;;  %vm1202_vm3 = vcmask (!%p267_p9), 261120   ;;  %s297_s12 = sand.u32 (!%p267_p9), 1, %s1981_s28   ;;  %s1513_s19 = sshll.u32 (!%p267_p9), %s2062_s9, 5 }
  0x10   : > { %1794 = vmatprep.subr.bf16.mxu0 (!%p267_p9), %v1793_v3  ;;  %1877 = vmatprep.subr.bf16.mxu1 (!%p267_p9), %v1793_v3  ;;  %s1439_s13 = sshll.u32 (!%p267_p9), %s297_s12, 1  ;;  %s2410_s24 = scalar_lea.hbm (!%p267_p9), %s2460_s8, %s1513_s19 }
  0x11   : > { %1796 = vmatpush3.bf16.msra.mxu0 (!%p267_p9), %v1793_v3  ;;  %1880 = vmatpush3.bf16.msra.mxu1 (!%p267_p9), %v1793_v3  ;;  %s299_s20 = scalar_lea.vmem (!%p267_p9), [#allocation2], %s1439_s13  ;;  %s1363_s25 = scalar_lea.sflag (!%p267_p9), [#allocation3], %s297_s12 }
  0x12   : > { %1798 = vmatprep.subr.bf16.mxu0 (!%p267_p9), %v1797_v5  ;;  %1878 = vmatprep.subr.bf16.mxu1 (!%p267_p9), %v1797_v5  ;;  %s1376_s21 = sshll.u32 (!%p267_p9), %s299_s20, 4  ;;  %s1995_s9 = smov (!%p267_p9), [#allocation2]   ;;  %s2412_s21 = int_to_ptr.vmem [resolvable:$true] %s1376_s21 }
  0x13   : > { %s1931_s10 = sshll.u32 (!%p267_p9), %s1995_s9, 4  ;;  %s1932_s10 = int_to_ptr.vmem [resolvable:$false] %s1931_s10 }
  0x14   : > { %s1933_s13 = scalar_lea.vmem (!%p267_p9), %s1932_s10, 64  ;;  %p1934_p0 = scmp.lt.s32.totalorder (!%p267_p9), %s2412_s21, %s1932_s10 }
  0x15   : > { %s2468_s23 = smov (!%p301_p10, %s1440_s23), 127  ;;  %1800 = vmatpush3.bf16.msra.mxu0 %v1797_v5  ;;  %1881 = vmatpush3.bf16.msra.mxu1 %v1797_v5 }
  0x16   : > { %s1441_s26 = sshll.u32 %s2468_s23, 3  ;;  %1673 = vmatprep.subr.msk.mxu0 %vm575_vm1, %v374_v6  ;;  %1879 = vmatprep.subr.msk.mxu1 %vm575_vm1, %v374_v6 }
  0x17   : > { %s2108_s18 = scalar_lea.vmem %s2452_s0, %s1441_s26  ;;  %s1927_s26 = scalar_lea.vmem %s2412_s21, 32 }
  0x18   : > { %v306_v7 = vld [vmem:[%s2108_s18] sm:$0xff]  ;;  %v307_v8 = vld [vmem:[%s2108_s18 + $0x8] sm:$0xff]  ;;  %v308_v9 = vld [vmem:[%s2108_s18 + $0x10] sm:$0xff]  ;;  %p1928_p11 = scmp.ne.s32.totalorder %s2412_s21, %s1927_s26  ;;  %p1935_p1 = scmp.lt.s32.totalorder %s1933_s13, %s1927_s26 }
  0x19   : > { %1675 = vmatprep.mubr.msk.f32.mxu0 %vm382_vm0, %v306_v7  ;;  %1674 = vmatpush3.msk.msra.mxu0 %vm575_vm1, %v374_v6  ;;  %v309_v10 = vld [vmem:[%s2108_s18 + $0x18] sm:$0xff]  ;;  %v310_v11 = vld [vmem:[%s2108_s18 + $0x20] sm:$0xff]  ;;  %v352_v12 = vld [vmem:[%s2108_s18 + $0x170] sm:$0xff]  ;;  %v1991_v7 = vmov 1983009808  }
  0x1a   : > { %1676 = vmatmul.mubr.msk.f32.vlgmr.msra.gmra.mrb[0].mxu0 %vm382_vm0, %v307_v8  ;;  %1882 = vmatpush3.msk.msra.mxu1 %vm575_vm1, %v374_v6  ;;  %v311_v13 = vld [vmem:[%s2108_s18 + $0x28] sm:$0xff]  ;;  %v353_v14 = vld [vmem:[%s2108_s18 + $0x178] sm:$0xff]  ;;  %v354_v15 = vld [vmem:[%s2108_s18 + $0x180] sm:$0xff]  ;;  %v1032_v8 = vunpack.c.l.s4 %v1991_v7  ;;  %p1929_p12 = pnand %p1928_p11, %p2079_p5  ;;  %p1936_p2 = por %p1935_p1, %p1934_p0 }
  0x1b   : > { %1678 = vmatprep.mubr.msk.f32.mxu0 %vm382_vm0, %v308_v9  ;;  %1744 = vmatprep.mubr.msk.f32.mxu1 %vm382_vm0, %v352_v12  ;;  %v312_v16 = vld [vmem:[%s2108_s18 + $0x30] sm:$0xff]  ;;  %v355_v17 = vld [vmem:[%s2108_s18 + $0x188] sm:$0xff]  ;;  %v313_v19 = vld [vmem:[%s2108_s18 + $0x38] sm:$0xff]  ;;  %v1034_v9 = vlaneseq }
  0x1c   : > { %1745 = vmatmul.mubr.msk.f32.vlgmr.msra.gmra.mrb[0].mxu1 %vm382_vm0, %v353_v14  ;;  %v356_v18 = vld [vmem:[%s2108_s18 + $0x190] sm:$0xff]  ;;  %v314_v20 = vld [vmem:[%s2108_s18 + $0x40] sm:$0xff]  ;;  %v357_v21 = vld [vmem:[%s2108_s18 + $0x198] sm:$0xff]  ;;  %p1930_p13 = pneg %p1929_p12 }
  0x1d   : > { %1747 = vmatprep.mubr.msk.f32.mxu1 %vm382_vm0, %v354_v15  ;;  %v358_v22 = vld [vmem:[%s2108_s18 + $0x1a0] sm:$0xff]  ;;  %v315_v23 = vld [vmem:[%s2108_s18 + $0x48] sm:$0xff]  ;;  %v316_v24 = vld [vmem:[%s2108_s18 + $0x50] sm:$0xff] }
  0x1e   : > { %1679 = vmatmul.mubr.msk.f32.gmra.mrb[2].mxu0 %vm382_vm0, %v309_v10  ;;  %v359_v25 = vld [vmem:[%s2108_s18 + $0x1a8] sm:$0xff]  ;;  %v360_v26 = vld [vmem:[%s2108_s18 + $0x1b0] sm:$0xff]  ;;  %v317_v27 = vld [vmem:[%s2108_s18 + $0x58] sm:$0xff]  ;;  %v1033_v10 = vunpack.c.0.s8 %v1032_v8  ;;  %p1937_p3 = pnand %p1936_p2, %p1930_p13 }
  0x1f   : > { %1681 = vmatprep.mubr.msk.f32.mxu0 %vm382_vm0, %v310_v11  ;;  %v318_v28 = vld [vmem:[%s2108_s18 + $0x60] sm:$0xff]  ;;  %v361_v29 = vld [vmem:[%s2108_s18 + $0x1b8] sm:$0xff]  ;;  %v319_v31 = vld [vmem:[%s2108_s18 + $0x68] sm:$0xff]  ;;  %v1035_v11 = vshrl.u32 %v1034_v9, 7 }
  0x20   : > { %1748 = vmatmul.mubr.msk.f32.gmra.mrb[2].mxu1 %vm382_vm0, %v355_v17  ;;  %v362_v30 = vld [vmem:[%s2108_s18 + $0x1c0] sm:$0xff]  ;;  %v320_v32 = vld [vmem:[%s2108_s18 + $0x70] sm:$0xff]  ;;  %v363_v33 = vld [vmem:[%s2108_s18 + $0x1c8] sm:$0xff] }
  0x21   : > { %1750 = vmatprep.mubr.msk.f32.mxu1 %vm382_vm0, %v356_v18  ;;  %v364_v34 = vld [vmem:[%s2108_s18 + $0x1d0] sm:$0xff]  ;;  %v321_v35 = vld [vmem:[%s2108_s18 + $0x78] sm:$0xff]  ;;  %v322_v36 = vld [vmem:[%s2108_s18 + $0x80] sm:$0xff]  ;;  %v1036_v12 = vsub.s32 %v1033_v10, %v1035_v11 }
  0x22   : > { %1682 = vmatmul.mubr.msk.f32.gmra.mrb[4].mxu0 %vm382_vm0, %v311_v13  ;;  %v365_v37 = vld [vmem:[%s2108_s18 + $0x1d8] sm:$0xff]  ;;  %v366_v38 = vld [vmem:[%s2108_s18 + $0x1e0] sm:$0xff]  ;;  %v323_v39 = vld [vmem:[%s2108_s18 + $0x88] sm:$0xff] }
  0x23   : > { %1684 = vmatprep.mubr.msk.f32.mxu0 %vm382_vm0, %v312_v16  ;;  %v324_v40 = vld [vmem:[%s2108_s18 + $0x90] sm:$0xff]  ;;  %v367_v41 = vld [vmem:[%s2108_s18 + $0x1e8] sm:$0xff]  ;;  %v325_v43 = vld [vmem:[%s2108_s18 + $0x98] sm:$0xff] }
  0x24   : > { %1751 = vmatmul.mubr.msk.f32.gmra.mrb[4].mxu1 %vm382_vm0, %v357_v21  ;;  %v368_v42 = vld [vmem:[%s2108_s18 + $0x1f0] sm:$0xff]  ;;  %v326_v44 = vld [vmem:[%s2108_s18 + $0xa0] sm:$0xff]  ;;  %v369_v45 = vld [vmem:[%s2108_s18 + $0x1f8] sm:$0xff] }
  0x25   : > { %1753 = vmatprep.mubr.msk.f32.mxu1 %vm382_vm0, %v358_v22  ;;  %v327_v46 = vld [vmem:[%s2108_s18 + $0xa8] sm:$0xff]  ;;  %v328_v47 = vld [vmem:[%s2108_s18 + $0xb0] sm:$0xff]  ;;  %v329_v48 = vld [vmem:[%s2108_s18 + $0xb8] sm:$0xff] }
  0x26   : > { %1685 = vmatmul.mubr.msk.f32.gmra.mrb[6].mxu0 %vm382_vm0, %v313_v19  ;;  %v330_v49 = vld [vmem:[%s2108_s18 + $0xc0] sm:$0xff]  ;;  %v331_v50 = vld [vmem:[%s2108_s18 + $0xc8] sm:$0xff]  ;;  %v332_v51 = vld [vmem:[%s2108_s18 + $0xd0] sm:$0xff] }
  0x27   : > { %1687 = vmatprep.mubr.msk.f32.mxu0 %vm382_vm0, %v314_v20  ;;  %v333_v52 = vld [vmem:[%s2108_s18 + $0xd8] sm:$0xff]  ;;  %v334_v53 = vld [vmem:[%s2108_s18 + $0xe0] sm:$0xff]  ;;  %v335_v54 = vld [vmem:[%s2108_s18 + $0xe8] sm:$0xff] }
  0x28   : > { %1754 = vmatmul.mubr.msk.f32.gmra.mrb[6].mxu1 %vm382_vm0, %v359_v25  ;;  %v336_v55 = vld [vmem:[%s2108_s18 + $0xf0] sm:$0xff]  ;;  %v337_v56 = vld [vmem:[%s2108_s18 + $0xf8] sm:$0xff]  ;;  %v338_v57 = vld [vmem:[%s2108_s18 + $0x100] sm:$0xff] }
  0x29   : > { %1756 = vmatprep.mubr.msk.f32.mxu1 %vm382_vm0, %v360_v26  ;;  %v339_v58 = vld [vmem:[%s2108_s18 + $0x108] sm:$0xff]  ;;  %v340_v59 = vld [vmem:[%s2108_s18 + $0x110] sm:$0xff]  ;;  %v341_v60 = vld [vmem:[%s2108_s18 + $0x118] sm:$0xff] }
  0x2a   : > { %1688 = vmatmul.mubr.msk.f32.gmra.mrb[8].mxu0 %vm382_vm0, %v315_v23  ;;  %v342_v61 = vld [vmem:[%s2108_s18 + $0x120] sm:$0xff]  ;;  %v343_v62 = vld [vmem:[%s2108_s18 + $0x128] sm:$0xff]  ;;  %v344_v63 = vld [vmem:[%s2108_s18 + $0x130] sm:$0xff] }
  0x2b   : > { %1690 = vmatprep.mubr.msk.f32.mxu0 %vm382_vm0, %v316_v24  ;;  %v345_v0 = vld [vmem:[%s2108_s18 + $0x138] sm:$0xff]  ;;  %v346_v1 = vld [vmem:[%s2108_s18 + $0x140] sm:$0xff]  ;;  %v347_v2 = vld [vmem:[%s2108_s18 + $0x148] sm:$0xff] }
  0x2c   : > { %1757 = vmatmul.mubr.msk.f32.gmra.mrb[8].mxu1 %vm382_vm0, %v361_v29  ;;  %v348_v3 = vld [vmem:[%s2108_s18 + $0x150] sm:$0xff]  ;;  %v349_v4 = vld [vmem:[%s2108_s18 + $0x158] sm:$0xff]  ;;  %v350_v5 = vld [vmem:[%s2108_s18 + $0x160] sm:$0xff] }
  0x2d   : > { %1759 = vmatprep.mubr.msk.f32.mxu1 %vm382_vm0, %v362_v30  ;;  %v351_v6 = vld [vmem:[%s2108_s18 + $0x168] sm:$0xff]  ;;  %v1028_v13 = vld [vmem:[%s2455_s3] sm:$0xff] }
  0x2e   : > { %1691 = vmatmul.mubr.msk.f32.gmra.mrb[10].mxu0 %vm382_vm0, %v317_v27  ;;  %v2241_v14 = vrot.slane %v1028_v13, %v1036_v12  ;;  %v1030_v16 = vcombine.high %v1028_v13, %v1028_v13  ;;  %v2250_v18 = vld [vmem:[%s2454_s2] ss:$0 sm:$0xff] }
  0x2f   : > { %1693 = vmatprep.mubr.msk.f32.mxu0 %vm382_vm0, %v318_v28 }
  0x30   : > { %1760 = vmatmul.mubr.msk.f32.gmra.mrb[10].mxu1 %vm382_vm0, %v363_v33  ;;  %v1045_v15 = vcombine.high %v2241_v14, %v2241_v14  ;;  %v2245_v17 = vrot.slane %v1030_v16, %v1036_v12 }
  0x31   : > { %1762 = vmatprep.mubr.msk.f32.mxu1 %vm382_vm0, %v364_v34 }
  0x32   : > { %1694 = vmatmul.mubr.msk.f32.gmra.mrb[12].mxu0 %vm382_vm0, %v319_v31 }
  0x33   : > { %1696 = vmatprep.mubr.msk.f32.mxu0 %vm382_vm0, %v320_v32 }
  0x34   : > { %1763 = vmatmul.mubr.msk.f32.gmra.mrb[12].mxu1 %vm382_vm0, %v365_v37 }
  0x35   : > { %1765 = vmatprep.mubr.msk.f32.mxu1 %vm382_vm0, %v366_v38 }
  0x36   : > { %1697 = vmatmul.mubr.msk.f32.gmra.mrb[14].mxu0 %vm382_vm0, %v321_v35 }
  0x37   : > { %1699 = vmatprep.mubr.msk.f32.mxu0 %vm382_vm0, %v322_v36 }
  0x38   : > { %1766 = vmatmul.mubr.msk.f32.gmra.mrb[14].mxu1 %vm382_vm0, %v367_v41 }
  0x39   : > { %1768 = vmatprep.mubr.msk.f32.mxu1 %vm382_vm0, %v368_v42 }
  0x3a   : > { %1700 = vmatmul.mubr.msk.f32.gmra.mrb[16].mxu0 %vm382_vm0, %v323_v39 }
  0x3b   : > { %1702 = vmatprep.mubr.msk.f32.mxu0 %vm382_vm0, %v324_v40 }
  0x3c   : > { %1769 = vmatmul.mubr.msk.f32.gmra.mrb[16].mxu1 %vm382_vm0, %v369_v45 }
  0x3d   : > { %1115 = vmatprep.mubr.f32.mxu1 %v1045_v15 }
  0x3e   : > { %1703 = vmatmul.mubr.msk.f32.gmra.mrb[18].mxu0 %vm382_vm0, %v325_v43 }
  0x3f   : > { %1705 = vmatprep.mubr.msk.f32.mxu0 %vm382_vm0, %v326_v44 }
  0x42   : > { %1706 = vmatmul.mubr.msk.f32.gmra.mrb[20].mxu0 %vm382_vm0, %v327_v46 }
  0x43   : > { %1708 = vmatprep.mubr.msk.f32.mxu0 %vm382_vm0, %v328_v47 }
  0x46   : > { %1709 = vmatmul.mubr.msk.f32.gmra.mrb[22].mxu0 %vm382_vm0, %v329_v48 }
  0x47   : > { %1711 = vmatprep.mubr.msk.f32.mxu0 %vm382_vm0, %v330_v49 }
  0x4a   : > { %1712 = vmatmul.mubr.msk.f32.gmra.mrb[24].mxu0 %vm382_vm0, %v331_v50 }
  0x4b   : > { %1714 = vmatprep.mubr.msk.f32.mxu0 %vm382_vm0, %v332_v51 }
  0x4e   : > { %1715 = vmatmul.mubr.msk.f32.gmra.mrb[26].mxu0 %vm382_vm0, %v333_v52 }
  0x4f   : > { %1717 = vmatprep.mubr.msk.f32.mxu0 %vm382_vm0, %v334_v53 }
  0x52   : > { %1718 = vmatmul.mubr.msk.f32.gmra.mrb[28].mxu0 %vm382_vm0, %v335_v54 }
  0x53   : > { %1720 = vmatprep.mubr.msk.f32.mxu0 %vm382_vm0, %v336_v55 }
  0x56   : > { %1721 = vmatmul.mubr.msk.f32.gmra.mrb[30].mxu0 %vm382_vm0, %v337_v56 }
  0x57   : > { %1723 = vmatprep.mubr.msk.f32.mxu0 %vm382_vm0, %v338_v57 }
  0x5a   : > { %1724 = vmatmul.mubr.msk.f32.gmra.mrb[32].mxu0 %vm382_vm0, %v339_v58 }
  0x5b   : > { %1726 = vmatprep.mubr.msk.f32.mxu0 %vm382_vm0, %v340_v59 }
  0x5e   : > { %1727 = vmatmul.mubr.msk.f32.gmra.mrb[34].mxu0 %vm382_vm0, %v341_v60 }
  0x5f   : > { %1729 = vmatprep.mubr.msk.f32.mxu0 %vm382_vm0, %v342_v61 }
  0x62   : > { %1730 = vmatmul.mubr.msk.f32.gmra.mrb[36].mxu0 %vm382_vm0, %v343_v62 }
  0x63   : > { %1732 = vmatprep.mubr.msk.f32.mxu0 %vm382_vm0, %v344_v63 }
  0x66   : > { %1733 = vmatmul.mubr.msk.f32.gmra.mrb[38].mxu0 %vm382_vm0, %v345_v0 }
  0x67   : > { %1735 = vmatprep.mubr.msk.f32.mxu0 %vm382_vm0, %v346_v1 }
  0x6a   : > { %1736 = vmatmul.mubr.msk.f32.gmra.mrb[40].mxu0 %vm382_vm0, %v347_v2 }
  0x6b   : > { %1738 = vmatprep.mubr.msk.f32.mxu0 %vm382_vm0, %v348_v3 }
  0x6e   : > { %1739 = vmatmul.mubr.msk.f32.gmra.mrb[42].mxu0 %vm382_vm0, %v349_v4 }
  0x6f   : > { %1741 = vmatprep.mubr.msk.f32.mxu0 %vm382_vm0, %v350_v5 }
  0x72   : > { %1742 = vmatmul.mubr.msk.f32.gmra.mrb[44].mxu0 %vm382_vm0, %v351_v6 }
  0xed   : > { %v1677_v19 = vpop.f32.mrb[0].mxu0 }
  0xee   : > { %v651_v20 = vadd.f32 %v1677_v19, %v2250_v18  ;;  %v645_v21 = vpop.f32.mrb[1].mxu0 }
  0xef   : > { %v646_v22 = vadd.f32 %v2250_v18, %v645_v21  ;;  %v1746_v30 = vpop.f32.mrb[0].mxu1 }
  0xf0   : > { %v965_v23 = vmax.f32 %v651_v20, 0.0  ;;  %v881_v32 = vadd.f32 %v1746_v30, %v2250_v18  ;;  %v875_v33 = vpop.f32.mrb[1].mxu1 }
  0xf1   : > { %v964_v24 = vmax.f32 %v646_v22, 0.0  ;;  %v1680_v25 = vpop.f32.mrb[2].mxu0  ;;  %v876_v36 = vadd.f32 %v2250_v18, %v875_v33 }
  0xf2   : > { %v661_v26 = vadd.f32 %v1680_v25, %v2250_v18  ;;  %v655_v27 = vpop.f32.mrb[3].mxu0  ;;  %v1011_v39 = vmax.f32 %v881_v32, 0.0 }
  0xf3   : > { %v2255_v28 = vpack.c.bf16 %v965_v23, %v964_v24  ;;  %v656_v29 = vadd.f32 %v2250_v18, %v655_v27  ;;  %v1010_v42 = vmax.f32 %v876_v36, 0.0  ;;  %v1749_v43 = vpop.f32.mrb[2].mxu1 }
  0xf4   : > { %v967_v31 = vmax.f32 %v661_v26, 0.0  ;;  %v891_v45 = vadd.f32 %v1749_v43, %v2250_v18  ;;  %v885_v46 = vpop.f32.mrb[3].mxu1 }
  0xf5   : > { %v966_v34 = vmax.f32 %v656_v29, 0.0  ;;  %v1683_v35 = vpop.f32.mrb[4].mxu0  ;;  %v2265_v49 = vpack.c.bf16 %v1011_v39, %v1010_v42  ;;  %v886_v50 = vadd.f32 %v2250_v18, %v885_v46 }
  0xf6   : > { %v671_v37 = vadd.f32 %v1683_v35, %v2250_v18  ;;  %v665_v38 = vpop.f32.mrb[5].mxu0  ;;  %v1013_v53 = vmax.f32 %v891_v45, 0.0 }
  0xf7   : > { %v2261_v40 = vpack.c.bf16 %v967_v31, %v966_v34  ;;  %v666_v41 = vadd.f32 %v2250_v18, %v665_v38  ;;  %v1012_v56 = vmax.f32 %v886_v50, 0.0  ;;  %v1752_v57 = vpop.f32.mrb[4].mxu1 }
  0xf8   : > { %v969_v44 = vmax.f32 %v671_v37, 0.0  ;;  %v901_v59 = vadd.f32 %v1752_v57, %v2250_v18  ;;  %v895_v60 = vpop.f32.mrb[5].mxu1 }
  0xf9   : > { %v968_v47 = vmax.f32 %v666_v41, 0.0  ;;  %v1686_v48 = vpop.f32.mrb[6].mxu0  ;;  %v2273_v63 = vpack.c.bf16 %v1013_v53, %v1012_v56  ;;  %v896_v0 = vadd.f32 %v2250_v18, %v895_v60 }
  0xfa   : > { %v681_v51 = vadd.f32 %v1686_v48, %v2250_v18  ;;  %v675_v52 = vpop.f32.mrb[7].mxu0  ;;  %v1015_v3 = vmax.f32 %v901_v59, 0.0 }
  0xfb   : > { %v2269_v54 = vpack.c.bf16 %v969_v44, %v968_v47  ;;  %v676_v55 = vadd.f32 %v2250_v18, %v675_v52  ;;  %v1014_v6 = vmax.f32 %v896_v0, 0.0  ;;  %v1755_v7 = vpop.f32.mrb[6].mxu1 }
  0xfc   : > { %v971_v58 = vmax.f32 %v681_v51, 0.0  ;;  %v911_v9 = vadd.f32 %v1755_v7, %v2250_v18  ;;  %v905_v10 = vpop.f32.mrb[7].mxu1 }
  0xfd   : > { %v970_v61 = vmax.f32 %v676_v55, 0.0  ;;  %v1689_v62 = vpop.f32.mrb[8].mxu0  ;;  %v2281_v13 = vpack.c.bf16 %v1015_v3, %v1014_v6  ;;  %v906_v15 = vadd.f32 %v2250_v18, %v905_v10 }
  0xfe   : > { %v691_v1 = vadd.f32 %v1689_v62, %v2250_v18  ;;  %v685_v2 = vpop.f32.mrb[9].mxu0  ;;  %v1017_v20 = vmax.f32 %v911_v9, 0.0 }
  0xff   : > { %v2277_v4 = vpack.c.bf16 %v971_v58, %v970_v61  ;;  %v686_v5 = vadd.f32 %v2250_v18, %v685_v2  ;;  %v1016_v23 = vmax.f32 %v906_v15, 0.0  ;;  %v1758_v24 = vpop.f32.mrb[8].mxu1 }
 0x100   : > { %v973_v8 = vmax.f32 %v691_v1, 0.0  ;;  %v921_v26 = vadd.f32 %v1758_v24, %v2250_v18  ;;  %v915_v27 = vpop.f32.mrb[9].mxu1 }
 0x101   : > { %v972_v11 = vmax.f32 %v686_v5, 0.0  ;;  %v1692_v12 = vpop.f32.mrb[10].mxu0  ;;  %v2289_v31 = vpack.c.bf16 %v1017_v20, %v1016_v23  ;;  %v916_v32 = vadd.f32 %v2250_v18, %v915_v27 }
 0x102   : > { %v701_v16 = vadd.f32 %v1692_v12, %v2250_v18  ;;  %v695_v19 = vpop.f32.mrb[11].mxu0  ;;  %v1019_v35 = vmax.f32 %v921_v26, 0.0 }
 0x103   : > { %v2285_v21 = vpack.c.bf16 %v973_v8, %v972_v11  ;;  %v696_v22 = vadd.f32 %v2250_v18, %v695_v19  ;;  %v1018_v38 = vmax.f32 %v916_v32, 0.0  ;;  %v1761_v39 = vpop.f32.mrb[10].mxu1 }
 0x104   : > { %v975_v25 = vmax.f32 %v701_v16, 0.0  ;;  %v931_v42 = vadd.f32 %v1761_v39, %v2250_v18  ;;  %v925_v43 = vpop.f32.mrb[11].mxu1 }
 0x105   : > { %v974_v29 = vmax.f32 %v696_v22, 0.0  ;;  %v1695_v30 = vpop.f32.mrb[12].mxu0  ;;  %v2297_v46 = vpack.c.bf16 %v1019_v35, %v1018_v38  ;;  %v926_v47 = vadd.f32 %v2250_v18, %v925_v43 }
 0x106   : > { %v711_v33 = vadd.f32 %v1695_v30, %v2250_v18  ;;  %v705_v34 = vpop.f32.mrb[13].mxu0  ;;  %v1021_v51 = vmax.f32 %v931_v42, 0.0 }
 0x107   : > { %v2293_v36 = vpack.c.bf16 %v975_v25, %v974_v29  ;;  %v706_v37 = vadd.f32 %v2250_v18, %v705_v34  ;;  %v1020_v55 = vmax.f32 %v926_v47, 0.0  ;;  %v1764_v56 = vpop.f32.mrb[12].mxu1 }
 0x108   : > { %v977_v41 = vmax.f32 %v711_v33, 0.0  ;;  %v941_v58 = vadd.f32 %v1764_v56, %v2250_v18  ;;  %v935_v59 = vpop.f32.mrb[13].mxu1 }
 0x109   : > { %v976_v44 = vmax.f32 %v706_v37, 0.0  ;;  %v1698_v45 = vpop.f32.mrb[14].mxu0  ;;  %v2305_v62 = vpack.c.bf16 %v1021_v51, %v1020_v55  ;;  %v936_v0 = vadd.f32 %v2250_v18, %v935_v59 }
 0x10a   : > { %v721_v48 = vadd.f32 %v1698_v45, %v2250_v18  ;;  %v715_v50 = vpop.f32.mrb[15].mxu0  ;;  %v1023_v3 = vmax.f32 %v941_v58, 0.0 }
 0x10b   : > { %v2301_v52 = vpack.c.bf16 %v977_v41, %v976_v44  ;;  %v716_v53 = vadd.f32 %v2250_v18, %v715_v50  ;;  %v1022_v7 = vmax.f32 %v936_v0, 0.0  ;;  %v1767_v8 = vpop.f32.mrb[14].mxu1 }
 0x10c   : > { %v979_v57 = vmax.f32 %v721_v48, 0.0  ;;  %v951_v10 = vadd.f32 %v1767_v8, %v2250_v18  ;;  %v945_v11 = vpop.f32.mrb[15].mxu1 }
 0x10d   : > { %v978_v60 = vmax.f32 %v716_v53, 0.0  ;;  %v1701_v61 = vpop.f32.mrb[16].mxu0  ;;  %v2313_v16 = vpack.c.bf16 %v1023_v3, %v1022_v7  ;;  %v946_v19 = vadd.f32 %v2250_v18, %v945_v11 }
 0x10e   : > { %v731_v1 = vadd.f32 %v1701_v61, %v2250_v18  ;;  %v725_v2 = vpop.f32.mrb[17].mxu0  ;;  %v1025_v23 = vmax.f32 %v951_v10, 0.0 }
 0x10f   : > { %v2309_v5 = vpack.c.bf16 %v979_v57, %v978_v60  ;;  %v726_v6 = vadd.f32 %v2250_v18, %v725_v2  ;;  %v1024_v26 = vmax.f32 %v946_v19, 0.0  ;;  %v1770_v27 = vpop.f32.mrb[16].mxu1 }
 0x110   : > { %v981_v9 = vmax.f32 %v731_v1, 0.0  ;;  %v961_v30 = vadd.f32 %v1770_v27, %v2250_v18  ;;  %v955_v32 = vpop.f32.mrb[17].mxu1 }
 0x111   : > { %v980_v12 = vmax.f32 %v726_v6, 0.0  ;;  %v1704_v15 = vpop.f32.mrb[18].mxu0  ;;  %v2319_v35 = vpack.c.bf16 %v1025_v23, %v1024_v26  ;;  %v956_v37 = vadd.f32 %v2250_v18, %v955_v32 }
 0x112   : > { %v741_v20 = vadd.f32 %v1704_v15, %v2250_v18  ;;  %v735_v22 = vpop.f32.mrb[19].mxu0  ;;  %v1027_v41 = vmax.f32 %v961_v30, 0.0 }
 0x113   : > { %v1801_v24 = vpack.c.bf16 %v981_v9, %v980_v12  ;;  %v736_v25 = vadd.f32 %v2250_v18, %v735_v22  ;;  %v1026_v44 = vmax.f32 %v956_v37, 0.0 }
 0x114   : > { %v983_v29 = vmax.f32 %v741_v20, 0.0 }
 0x115   : > { %v982_v33 = vmax.f32 %v736_v25, 0.0  ;;  %v1707_v34 = vpop.f32.mrb[20].mxu0  ;;  %1802 = vmatprep.subr.bf16.mxu1 %v1801_v24  ;;  %v2325_v50 = vpack.c.bf16 %v1027_v41, %v1026_v44 }
 0x116   : > { %v751_v38 = vadd.f32 %v1707_v34, %v2250_v18  ;;  %v745_v39 = vpop.f32.mrb[21].mxu0  ;;  %1804 = vmatpush3.bf16.msra.mxu1 %v2255_v28 }
 0x117   : > { %v1805_v42 = vpack.c.bf16 %v983_v29, %v982_v33  ;;  %v746_v43 = vadd.f32 %v2250_v18, %v745_v39 }
 0x118   : > { %v985_v45 = vmax.f32 %v751_v38, 0.0 }
 0x119   : > { %v984_v47 = vmax.f32 %v746_v43, 0.0  ;;  %v1710_v48 = vpop.f32.mrb[22].mxu0  ;;  %1806 = vmatprep.subr.bf16.mxu1 %v1805_v42  ;;  %v1046_v42 = vcombine.high %v2245_v17, %v2245_v17 }
 0x11a   : > { %v761_v51 = vadd.f32 %v1710_v48, %v2250_v18  ;;  %v755_v53 = vpop.f32.mrb[23].mxu0  ;;  %1808 = vmatpush3.bf16.msra.mxu1 %v2261_v40 }
 0x11b   : > { %v1809_v55 = vpack.c.bf16 %v985_v45, %v984_v47  ;;  %v756_v56 = vadd.f32 %v2250_v18, %v755_v53 }
 0x11c   : > { %v987_v28 = vmax.f32 %v761_v51, 0.0 }
 0x11d   : > { %v986_v57 = vmax.f32 %v756_v56, 0.0  ;;  %v1713_v58 = vpop.f32.mrb[24].mxu0  ;;  %1810 = vmatprep.subr.bf16.mxu1 %v1809_v55 }
 0x11e   : > { %v771_v59 = vadd.f32 %v1713_v58, %v2250_v18  ;;  %v765_v60 = vpop.f32.mrb[25].mxu0  ;;  %1812 = vmatpush3.bf16.msra.mxu1 %v2269_v54 }
 0x11f   : > { %v1813_v61 = vpack.c.bf16 %v987_v28, %v986_v57  ;;  %v766_v0 = vadd.f32 %v2250_v18, %v765_v60 }
 0x120   : > { %v989_v1 = vmax.f32 %v771_v59, 0.0 }
 0x121   : > { %v988_v2 = vmax.f32 %v766_v0, 0.0  ;;  %v1716_v3 = vpop.f32.mrb[26].mxu0  ;;  %1814 = vmatprep.subr.bf16.mxu1 %v1813_v61 }
 0x122   : > { %v781_v40 = vadd.f32 %v1716_v3, %v2250_v18  ;;  %v775_v6 = vpop.f32.mrb[27].mxu0  ;;  %1816 = vmatpush3.bf16.msra.mxu1 %v2277_v4 }
 0x123   : > { %v1817_v7 = vpack.c.bf16 %v989_v1, %v988_v2  ;;  %v776_v8 = vadd.f32 %v2250_v18, %v775_v6 }
 0x124   : > { %v991_v9 = vmax.f32 %v781_v40, 0.0 }
 0x125   : > { %v990_v10 = vmax.f32 %v776_v8, 0.0  ;;  %v1719_v11 = vpop.f32.mrb[28].mxu0  ;;  %1818 = vmatprep.subr.bf16.mxu1 %v1817_v7 }
 0x126   : > { %v791_v54 = vadd.f32 %v1719_v11, %v2250_v18  ;;  %v785_v12 = vpop.f32.mrb[29].mxu0  ;;  %1820 = vmatpush3.bf16.msra.mxu1 %v2285_v21 }
 0x127   : > { %v1821_v15 = vpack.c.bf16 %v991_v9, %v990_v10  ;;  %v786_v19 = vadd.f32 %v2250_v18, %v785_v12 }
 0x128   : > { %v993_v20 = vmax.f32 %v791_v54, 0.0 }
 0x129   : > { %v992_v22 = vmax.f32 %v786_v19, 0.0  ;;  %v1722_v23 = vpop.f32.mrb[30].mxu0  ;;  %1822 = vmatprep.subr.bf16.mxu1 %v1821_v15 }
 0x12a   : > { %v801_v4 = vadd.f32 %v1722_v23, %v2250_v18  ;;  %v795_v24 = vpop.f32.mrb[31].mxu0  ;;  %1824 = vmatpush3.bf16.msra.mxu1 %v2293_v36 }
 0x12b   : > { %v1825_v25 = vpack.c.bf16 %v993_v20, %v992_v22  ;;  %v796_v26 = vadd.f32 %v2250_v18, %v795_v24 }
 0x12c   : > { %v995_v27 = vmax.f32 %v801_v4, 0.0 }
 0x12d   : > { %v994_v29 = vmax.f32 %v796_v26, 0.0  ;;  %1826 = vmatprep.subr.bf16.mxu1 %v1825_v25  ;;  %v1725_v30 = vpop.f32.mrb[32].mxu0 }
 0x12e   : > { %v811_v21 = vadd.f32 %v1725_v30, %v2250_v18  ;;  %1828 = vmatpush3.bf16.msra.mxu1 %v2301_v52  ;;  %v805_v32 = vpop.f32.mrb[33].mxu0  ;;  %v1278_v30 = vld [vmem:[%s2458_s6 + $0x8] sm:$0xff] }
 0x12f   : > { %v1829_v33 = vpack.c.bf16 %v995_v27, %v994_v29  ;;  %v806_v34 = vadd.f32 %v2250_v18, %v805_v32  ;;  %v1277_v29 = vld [vmem:[%s2458_s6] sm:$0xff] }
 0x130   : > { %v997_v37 = vmax.f32 %v811_v21, 0.0 }
 0x131   : > { %v996_v38 = vmax.f32 %v806_v34, 0.0  ;;  %1830 = vmatprep.subr.bf16.mxu1 %v1829_v33  ;;  %v1728_v39 = vpop.f32.mrb[34].mxu0  ;;  %v1872_v33 = vpack.c.bf16 %v1278_v30, %v1277_v29 }
 0x132   : > { %v821_v36 = vadd.f32 %v1728_v39, %v2250_v18  ;;  %1832 = vmatpush3.bf16.msra.mxu1 %v2309_v5  ;;  %v815_v41 = vpop.f32.mrb[35].mxu0 }
 0x133   : > { %v1835_v43 = vpack.c.bf16 %v997_v37, %v996_v38  ;;  %v816_v44 = vadd.f32 %v2250_v18, %v815_v41  ;;  %1834 = vmatprep.subr.bf16.mxu1 %v2273_v63  ;;  %v1279_v37 = vld [vmem:[%s2458_s6 + $0x10] sm:$0xff]  ;;  %v1280_v38 = vld [vmem:[%s2458_s6 + $0x18] sm:$0xff] }
 0x134   : > { %v999_v52 = vmax.f32 %v821_v36, 0.0  ;;  %v1875_v39 = vpack.c.bf16 %v1280_v38, %v1279_v37  ;;  %v1508_v36 = vld [vmem:[%s2457_s5] ss:$0 sm:$0xff] }
 0x135   : > { %v998_v45 = vmax.f32 %v816_v44, 0.0  ;;  %v1731_v47 = vpop.f32.mrb[36].mxu0  ;;  %1116 = vmatmul.mubr.f32.vlgmr.msra.gmra.mrb[18].mxu1 %v2241_v14 }
 0x136   : > { %v831_v48 = vadd.f32 %v1731_v47, %v2250_v18  ;;  %1836 = vmatpush3.bf16.msra.mxu1 %v1835_v43  ;;  %v825_v51 = vpop.f32.mrb[37].mxu0  ;;  %1185 = vmatprep.mubr.f32.mxu1 %v1046_v42 }
 0x137   : > { %v1839_v5 = vpack.c.bf16 %v999_v52, %v998_v45  ;;  %v826_v53 = vadd.f32 %v2250_v18, %v825_v51  ;;  %1838 = vmatprep.subr.bf16.mxu1 %v2281_v13  ;;  %v1510_v52 = vld [vmem:[%s2459_s7] ss:$0 sm:$0xff] }
 0x138   : > { %v1001_v55 = vmax.f32 %v831_v48, 0.0 }
 0x139   : > { %v1000_v56 = vmax.f32 %v826_v53, 0.0  ;;  %v1734_v28 = vpop.f32.mrb[38].mxu0 }
 0x13a   : > { %v841_v63 = vadd.f32 %v1734_v28, %v2250_v18  ;;  %1840 = vmatpush3.bf16.msra.mxu1 %v1839_v5  ;;  %v835_v57 = vpop.f32.mrb[39].mxu0 }
 0x13b   : > { %v1843_v58 = vpack.c.bf16 %v1001_v55, %v1000_v56  ;;  %v836_v14 = vadd.f32 %v2250_v18, %v835_v57  ;;  %1842 = vmatprep.subr.bf16.mxu1 %v2289_v31 }
 0x13c   : > { %v1003_v59 = vmax.f32 %v841_v63, 0.0 }
 0x13d   : > { %v1002_v60 = vmax.f32 %v836_v14, 0.0  ;;  %v1737_v61 = vpop.f32.mrb[40].mxu0 }
 0x13e   : > { %v851_v0 = vadd.f32 %v1737_v61, %v2250_v18  ;;  %1844 = vmatpush3.bf16.msra.mxu1 %v1843_v58  ;;  %v845_v1 = vpop.f32.mrb[41].mxu0 }
 0x13f   : > { %v1847_v13 = vpack.c.bf16 %v1003_v59, %v1002_v60  ;;  %v846_v2 = vadd.f32 %v2250_v18, %v845_v1  ;;  %1846 = vmatprep.subr.bf16.mxu1 %v2297_v46 }
 0x140   : > { %v1005_v3 = vmax.f32 %v851_v0, 0.0 }
 0x141   : > { %v1004_v40 = vmax.f32 %v846_v2, 0.0  ;;  %v1740_v6 = vpop.f32.mrb[42].mxu0 }
 0x142   : > { %v861_v7 = vadd.f32 %v1740_v6, %v2250_v18  ;;  %1848 = vmatpush3.bf16.msra.mxu1 %v1847_v13  ;;  %v855_v8 = vpop.f32.mrb[43].mxu0 }
 0x143   : > { %v1851_v31 = vpack.c.bf16 %v1005_v3, %v1004_v40  ;;  %v856_v9 = vadd.f32 %v2250_v18, %v855_v8  ;;  %1850 = vmatprep.subr.bf16.mxu1 %v2305_v62  ;;  %v1191_v62 = vld [vmem:[%s2456_s4] sm:$0xff] }
 0x144   : > { %v1007_v10 = vmax.f32 %v861_v7, 0.0 }
 0x145   : > { %v1006_v11 = vmax.f32 %v856_v9, 0.0  ;;  %v1743_v54 = vpop.f32.mrb[44].mxu0 }
 0x146   : > { %v871_v12 = vadd.f32 %v1743_v54, %v2250_v18  ;;  %1852 = vmatpush3.bf16.msra.mxu1 %v1851_v31  ;;  %v865_v15 = vpop.f32.mrb[45].mxu0 }
 0x147   : > { %v1855_v46 = vpack.c.bf16 %v1007_v10, %v1006_v11  ;;  %v866_v19 = vadd.f32 %v2250_v18, %v865_v15  ;;  %1854 = vmatprep.subr.bf16.mxu1 %v2313_v16  ;;  %v1192_v18 = vld [vmem:[%s2456_s4 + $0x8] sm:$0xff]  ;;  %v1992_v16 = vmov 0.0|0.0  }
 0x148   : > { %v1009_v20 = vmax.f32 %v871_v12, 0.0  ;;  %v1866_v4 = vpack.c.bf16 %v1192_v18, %v1191_v62 }
 0x149   : > { %v1008_v22 = vmax.f32 %v866_v19, 0.0 }
 0x14a   : > { %1856 = vmatpush3.bf16.msra.mxu1 %v1855_v46 }
 0x14b   : > { %v1859_v23 = vpack.c.bf16 %v1009_v20, %v1008_v22  ;;  %1858 = vmatprep.subr.bf16.mxu1 %v2319_v35  ;;  %v1193_v35 = vld [vmem:[%s2456_s4 + $0x10] sm:$0xff] }
 0x14e   : > { %1860 = vmatpush3.bf16.msra.mxu1 %v1859_v23 }
 0x14f   : > { %1862 = vmatprep.subr.bf16.mxu1 %v2325_v50  ;;  %v1994_v50 = vmov 0.0  }
 0x152   : > { %1864 = vmatpush3.bf16.msra.mxu1 %v2265_v49 }
 0x153   : > { %1865 = vmatprep.subr.bf16.mxu1 %v1992_v16 }
 0x155   : > { %1186 = vmatmul.mubr.f32.vlgmr.msra.gmra.mrb[20].mxu1 %v2245_v17  ;;  %v1194_v17 = vld [vmem:[%s2456_s4 + $0x18] sm:$0xff] }
 0x156   : > { %1867 = vmatpush3.bf16.msra.mxu1 %v1866_v4  ;;  %v1869_v49 = vpack.c.bf16 %v1194_v17, %v1193_v35  ;;  %1779 = vmatprep.mubr.msk.f32.mxu1 %vm1993_vm2, %v1994_v50 }
 0x157   : > { %1868 = vmatprep.subr.bf16.mxu1 %v1992_v16 }
 0x15a   : > { %1870 = vmatpush3.bf16.msra.mxu1 %v1869_v49 }
 0x15b   : > { %1871 = vmatprep.subr.bf16.mxu1 %v1992_v16 }
 0x208   : > { %v1617_v24 = vpop.f32.mrb[18].mxu1 }
 0x209   : > { %v1618_v25 = vpop.f32.mrb[19].mxu1 }
 0x20a   : > { %v1619_v26 = vadd.f32 %v1618_v25, %v1617_v24 }
 0x228   : > { %v1652_v27 = vpop.f32.mrb[20].mxu1 }
 0x229   : > { %v1653_v21 = vpop.f32.mrb[21].mxu1 }
 0x22a   : > { %v1654_v32 = vadd.f32 %v1653_v21, %v1652_v27 }
 0x22c   : > { %v1188_v34 = vadd.f32 %v1654_v32, %v1619_v26 }
 0x22e   : > { %1780 = vmatmul.mubr.msk.f32.vlgmr.msra.gmra.mrb[22].mxu1 %vm1202_vm3, %v1188_v34 }
 0x22f   : > { %1873 = vmatpush3.bf16.msra.mxu1 %v1872_v33  ;;  %1790 = vmatprep.mubr.msk.f32.mxu1 %vm1993_vm2, %v1994_v50 }
 0x230   : > { %1874 = vmatprep.subr.bf16.mxu1 %v1992_v16 }
 0x233   : > { %1876 = vmatpush3.bf16.msra.mxu1 %v1875_v39 }
 0x301   : > { %v1272_v41 = vpop.f32.mrb[22].mxu1 }
 0x302   : > { %v1273_v42 = vadd.f32 %v1508_v36, %v1272_v41  ;;  %v1781_v43 = vpop.f32.mrb[23].mxu1 }
 0x304   : > { %v1276_v44 = vmax.f32 %v1273_v42, 0.0 }
 0x306   : > { %1791 = vmatmul.mubr.msk.f32.vlgmr.msra.gmra.mrb[24].mxu1 %vm1202_vm3, %v1276_v44 }
 0x3d9   : > { %v1357_v45 = vpop.f32.mrb[24].mxu1 }
 0x3da   : > { %v1358_v47 = vadd.f32 %v1510_v52, %v1357_v45  ;;  %v1792_v48 = vpop.f32.mrb[25].mxu1 }
 0x3dc   : > { %1361 = vst [vmem:[%s299_s20] sm:$0x3] %v1358_v47 }
 0x3dd   : > { %1940 = shalt.err (!%p1937_p3)
}
 0x3de   : > { %s1941_s12 = scalar_lea.hbm %s2410_s24, 32  ;;  %s1945_s19 = scalar_lea.hbm %s2460_s8, 64 }
 0x3df   : > { %p1942_p4 = scmp.ne.s32.totalorder %s2410_s24, %s1941_s12  ;;  %p1946_p9 = scmp.lt.u32.totalorder %s2410_s24, %s2460_s8 }
 0x3e0   : > { %p1947_p10 = scmp.lt.u32.totalorder %s1945_s19, %s1941_s12  ;;  %p1949_p12 = scmp.lt.u32.totalorder %s1941_s12, %s2410_s24 }
 0x3e1   : > { %p1943_p7 = pnand %p1942_p4, %p2079_p5 }
 0x3e2   : > { %p1948_p11 = por %p1947_p10, %p1946_p9 }
 0x3e3   : > { %p1944_p8 = pneg %p1943_p7 }
 0x3e4   : > { %p1950_p13 = por %p1949_p12, %p1948_p11 }
 0x3e6   : > { %p1951_p0 = pnand %p1950_p13, %p1944_p8 }
 0x3e8   : > { %1954 = shalt.err (!%p1951_p0)
}
 0x3e9   : > { %1883 = dma.vmem_to_hbm [thread:$0]  (%p2079_p5), %s2412_s21, 32, %s2410_s24, %s1363_s25  }
 0x3ea PF: > { %p1889_p1 = scmp.ge.s32.totalorder %s1989_s30, 2  ;;  %s1388_s23 = sand.u32 1, %s1977_s27  }
 0x3eb   : > { %s1389_s26 = scalar_lea.sflag [#allocation3], %s1388_s23 }
 0x3ec   : > { %p1886_p2 = pnand %p1889_p1, %p2083_p6 }
 0x3ee   : > { %1972 = dma.done.wait (!%p1886_p2), %s1389_s26, 32  }
 0x3ef   : > { %1974 = vsyncadd (!%p1886_p2), %s1389_s26, 4294967264  ;;  %p18_p3 = scmp.ge.s32.totalorder %s2066_s11, 4   ;;  %s2463_s27 = smov %s1981_s28 }
 0x3f0   : > { %s2464_s28 = smov %s1985_s29  ;;  %s2465_s29 = smov %s2077_s14 }
 0x3f1   : > { %s2466_s30 = smov %s2066_s11  ;;  %20 = sbr.rel (!%p18_p3) target bundleno = 3 (0x3), region = 87 }
 0x3f8   :  { %1394 = vsyncpa [#allocation3], 1 }
 0x3f9   :  { %1396 = vsyncpa [#allocation3 + $0x1], 1 }

</bundles_post_ra>
